<compile_context>
chip_gen: v7x
topology: tpu7x:2x2x1
jax: 0.10.0
libtpu: 0.0.40
codegen_flags: <defaults>
</compile_context>

<pallas_src>
import functools

import jax
import jax.numpy as jnp
from jax.experimental import pallas as pl
from jax.experimental.pallas import tpu as pltpu

_HID = 100    # cls_subgroups hidden width (from the PyTorch module)
_LANE = 128


def _fused_width(num_intents: int) -> int:
    return ((num_intents + _HID + _LANE - 1) // _LANE) * _LANE


def dual_head_kernel(num_intents, x_ref, wf_ref, bf_ref, w2f_ref, b2_ref, out_ref):
    """One batch tile of both heads.

    x_ref  : (block_b, H) f32   last-timestep hidden states
    wf_ref : (H, W) bf16        [wi | w1 | 0-pad] fused first-layer weight
    bf_ref : (1, W) f32         [bi | b1 | 0-pad] fused bias row
    w2f_ref: (1, W) f32         w2 (100,1) placed at lanes [NI, NI+100), 0 elsewhere
    b2_ref : (1, 1) f32
    out_ref: (block_b, W) f32   lanes [0, NI) = intents, lane NI = subgroup logit
    """
    h = x_ref[...].astype(jnp.bfloat16)                   # MXU-native inputs
    z = jnp.dot(h, wf_ref[...], preferred_element_type=jnp.float32) + bf_ref[...]

    # cls_subgroups: ReLU then 100->1 projection on the VPU/XLU.  w2f is zero
    # outside the w1 lanes, so the full-width multiply-reduce is exact.
    hid = jnp.maximum(z, 0.0)
    sub = jnp.sum(hid * w2f_ref[...], axis=-1, keepdims=True) + b2_ref[...]

    # Pack a single lane-dense output slab with plain VPU select ops.
    lane = jax.lax.broadcasted_iota(jnp.int32, z.shape, 1)
    out = jnp.where(lane < num_intents, z, 0.0)
    out_ref[...] = jnp.where(lane == num_intents, sub, out)


def pack_params(params):
    """Offline weight prep: fuse/pad into lane-dense, MXU-friendly layouts."""
    wi, bi = params["wi"], params["bi"]          # (H, NI), (NI,)
    w1, b1 = params["w1"], params["b1"]          # (H, 100), (100,)
    w2, b2 = params["w2"], params["b2"]          # (100, 1), (1,)
    H, ni = wi.shape
    W = _fused_width(ni)

    wf = jnp.zeros((H, W), jnp.float32).at[:, :ni].set(wi).at[:, ni:ni + _HID].set(w1)
    bf = jnp.zeros((1, W), jnp.float32).at[0, :ni].set(bi).at[0, ni:ni + _HID].set(b1)
    w2f = jnp.zeros((1, W), jnp.float32).at[0, ni:ni + _HID].set(w2[:, 0])
    return {
        "wf": wf.astype(jnp.bfloat16),   # bf16 weights: half the DMA bytes
        "bf": bf,
        "w2f": w2f,
        "b2": b2.reshape(1, 1),
        "num_intents": ni,
    }


def dual_model_heads(last_hidden_state, packed):
    """Glue in JAX, fused hot path in Pallas. Returns (intents, subgroups)."""
    B, T, H = last_hidden_state.shape
    ni = packed["num_intents"]
    W = packed["wf"].shape[1]

    block_b = 8                                   # sublane-aligned batch tile
    nb = pl.cdiv(B, block_b)

    # Free, contiguous reshape; the BlockSpec below fetches only the
    # (block_b, H) last-timestep tile (block column T-1 of width H).
    x2d = last_hidden_state.reshape(B, T * H)

    cost = pl.CostEstimate(
        flops=2 * B * H * W + 4 * B * W,
        transcendentals=0,
        bytes_accessed=B * H * 4 + H * W * 2 + 2 * W * 4 + 4 + B * W * 4,
    )

    kernel = functools.partial(dual_head_kernel, ni)
    slab = pl.pallas_call(
        kernel,
        out_shape=jax.ShapeDtypeStruct((B, W), jnp.float32),
        grid_spec=pl.GridSpec(
            grid=(nb,),
            in_specs=[
                pl.BlockSpec((block_b, H), lambda i: (i, T - 1)),   # last timestep
                pl.BlockSpec((H, W), lambda i: (0, 0)),             # fused weight
                pl.BlockSpec((1, W), lambda i: (0, 0)),             # fused bias
                pl.BlockSpec((1, W), lambda i: (0, 0)),             # padded w2 row
                pl.BlockSpec((1, 1), lambda i: (0, 0)),             # b2
            ],
            out_specs=pl.BlockSpec((block_b, W), lambda i: (i, 0)),
        ),
        compiler_params=pltpu.CompilerParams(
            dimension_semantics=("parallel",),
        ),
        cost_estimate=cost,
    )(x2d, packed["wf"], packed["bf"], packed["w2f"], packed["b2"])

    out_int = slab[:, :ni]
    out_sub = slab[:, ni:ni + 1]
    return out_int, out_sub


def make_params(key, hidden_size, num_intents):
    ks = jax.random.split(key, 6)
    s_h = 1.0 / jnp.sqrt(hidden_size)
    s_m = 1.0 / jnp.sqrt(100.0)
    return {
        # cls_intents: Linear(hidden_size, num_intents)
        "wi": jax.random.normal(ks[0], (hidden_size, num_intents), jnp.float32) * s_h,
        "bi": jax.random.normal(ks[1], (num_intents,), jnp.float32) * 0.01,
        # cls_subgroups[0]: Linear(hidden_size, 100)
        "w1": jax.random.normal(ks[2], (hidden_size, 100), jnp.float32) * s_h,
        "b1": jax.random.normal(ks[3], (100,), jnp.float32) * 0.01,
        # cls_subgroups[3]: Linear(100, 1)
        "w2": jax.random.normal(ks[4], (100, 1), jnp.float32) * s_m,
        "b2": jax.random.normal(ks[5], (1,), jnp.float32) * 0.01,
    }


def reference_heads(last_hidden_state, params):
    """Pure-JAX f32 reference of the two heads (module semantics)."""
    h = last_hidden_state[:, -1, :]
    out_int = h @ params["wi"] + params["bi"][None, :]
    hid = jnp.maximum(h @ params["w1"] + params["b1"][None, :], 0.0)
    out_sub = hid @ params["w2"] + params["b2"][None, :]
    return out_int, out_sub


if __name__ == "__main__":
    key = jax.random.PRNGKey(0)
    k_x, k_p = jax.random.split(key)

    B, T, H = 8, 16, 768        # small batch/seq, hidden_size=768 per module default
    NUM_INTENTS = 16

    # Synthetic encoder output (stands in for base_model(...).last_hidden_state)
    last_hidden_state = jax.random.normal(k_x, (B, T, H), jnp.float32)
    params = make_params(k_p, H, NUM_INTENTS)
    packed = pack_params(params)

    out_intents, out_subgroups = dual_model_heads(last_hidden_state, packed)
    out_intents = jax.block_until_ready(out_intents)
    out_subgroups = jax.block_until_ready(out_subgroups)

    ref_int, ref_sub = reference_heads(last_hidden_state, params)
    assert out_intents.shape == (B, NUM_INTENTS)
    assert out_subgroups.shape == (B, 1)
    # bf16 fused first-layer weights -> loosened tolerance vs the f32 reference.
    assert jnp.allclose(out_intents, ref_int, atol=5e-2, rtol=5e-2)
    assert jnp.allclose(out_subgroups, ref_sub, atol=5e-2, rtol=5e-2)

    print("KERNEL_OK")
</pallas_src>

<mosaic_0001>
module attributes {stable_mosaic.version = 11 : i64} {
  func.func @dual_head_kernel(%arg0: i32, %arg1: memref<8x768xf32, #tpu.memory_space<vmem>>, %arg2: memref<768x128xbf16, #tpu.memory_space<vmem>>, %arg3: memref<1x128xf32, #tpu.memory_space<vmem>>, %arg4: memref<1x128xf32, #tpu.memory_space<vmem>>, %arg5: memref<1x1xf32, #tpu.memory_space<vmem>>, %arg6: memref<8x128xf32, #tpu.memory_space<vmem>>) attributes {dimension_semantics = [#tpu.dimension_semantics<parallel>], iteration_bounds = array<i64: 1>, scalar_prefetch = 0 : i64, scratch_operands = 0 : i64, tpu.core_type = #tpu.core_type<tc>, window_params = [{transform_indices = @transform_0, window_bounds = array<i64: 8, 768>}, {pipeline_mode = #tpu.pipeline_mode<synchronous>, transform_indices = @transform_1, window_bounds = array<i64: 768, 128>}, {pipeline_mode = #tpu.pipeline_mode<synchronous>, transform_indices = @transform_2, window_bounds = array<i64: 1, 128>}, {pipeline_mode = #tpu.pipeline_mode<synchronous>, transform_indices = @transform_3, window_bounds = array<i64: 1, 128>}, {pipeline_mode = #tpu.pipeline_mode<synchronous>, transform_indices = @transform_4, window_bounds = array<i64: 1, 1>}, {transform_indices = @transform_5, window_bounds = array<i64: 8, 128>}]} {
    %c0 = arith.constant 0 : index
    %c0_0 = arith.constant 0 : index
    %0 = vector.load %arg1[%c0, %c0_0] : memref<8x768xf32, #tpu.memory_space<vmem>>, vector<8x768xf32>
    %1 = arith.truncf %0 : vector<8x768xf32> to vector<8x768xbf16>
    %c0_1 = arith.constant 0 : index
    %c0_2 = arith.constant 0 : index
    %2 = vector.load %arg2[%c0_1, %c0_2] : memref<768x128xbf16, #tpu.memory_space<vmem>>, vector<768x128xbf16>
    %cst = arith.constant dense<0.000000e+00> : vector<8x128xf32>
    %3 = tpu.matmul %1, %2, %cst {dimension_numbers = #tpu.dot_dimension_numbers<[1], [0], [0], [1], [0, 0, 1, 1], [], []>} : vector<8x768xbf16>, vector<768x128xbf16>, vector<8x128xf32> -> vector<8x128xf32>
    %c0_3 = arith.constant 0 : index
    %c0_4 = arith.constant 0 : index
    %4 = vector.load %arg3[%c0_3, %c0_4] : memref<1x128xf32, #tpu.memory_space<vmem>>, vector<1x128xf32>
    %5 = vector.broadcast %4 : vector<1x128xf32> to vector<8x128xf32>
    %6 = arith.addf %3, %5 : vector<8x128xf32>
    %cst_5 = arith.constant 0.000000e+00 : f32
    %7 = vector.broadcast %cst_5 : f32 to vector<8x128xf32>
    %8 = arith.maximumf %6, %7 : vector<8x128xf32>
    %c0_6 = arith.constant 0 : index
    %c0_7 = arith.constant 0 : index
    %9 = vector.load %arg4[%c0_6, %c0_7] : memref<1x128xf32, #tpu.memory_space<vmem>>, vector<1x128xf32>
    %10 = vector.broadcast %9 : vector<1x128xf32> to vector<8x128xf32>
    %11 = arith.mulf %8, %10 : vector<8x128xf32>
    %cst_8 = arith.constant dense<0.000000e+00> : vector<8xf32>
    %12 = vector.multi_reduction <add>, %11, %cst_8 [1] : vector<8x128xf32> to vector<8xf32>
    %13 = vector.shape_cast %12 : vector<8xf32> to vector<8x1xf32>
    %c0_9 = arith.constant 0 : index
    %c0_10 = arith.constant 0 : index
    %14 = vector.load %arg5[%c0_9, %c0_10] : memref<1x1xf32, #tpu.memory_space<vmem>>, vector<1x1xf32>
    %15 = vector.broadcast %14 : vector<1x1xf32> to vector<8x1xf32>
    %16 = arith.addf %13, %15 : vector<8x1xf32>
    %17 = tpu.iota {dimensions = array<i32: 1>} : vector<8x128xi32>
    %c16_i32 = arith.constant 16 : i32
    %18 = vector.broadcast %c16_i32 : i32 to vector<8x128xi32>
    %19 = arith.cmpi slt, %17, %18 : vector<8x128xi32>
    %cst_11 = arith.constant 0.000000e+00 : f32
    %20 = vector.broadcast %cst_11 : f32 to vector<8x128xf32>
    %21 = arith.select %19, %6, %20 : vector<8x128xi1>, vector<8x128xf32>
    %c16_i32_12 = arith.constant 16 : i32
    %22 = vector.broadcast %c16_i32_12 : i32 to vector<8x128xi32>
    %23 = arith.cmpi eq, %17, %22 : vector<8x128xi32>
    %24 = vector.shape_cast %16 : vector<8x1xf32> to vector<8x1xf32>
    %25 = vector.broadcast %24 : vector<8x1xf32> to vector<8x128xf32>
    %26 = arith.select %23, %25, %21 : vector<8x128xi1>, vector<8x128xf32>
    %c0_13 = arith.constant 0 : index
    %c0_14 = arith.constant 0 : index
    %27 = vector.load %arg6[%c0_13, %c0_14] : memref<8x128xf32, #tpu.memory_space<vmem>>, vector<8x128xf32>
    tpu.vector_store %arg6[%c0_13, %c0_14], %26 {strides = array<i32>} : memref<8x128xf32, #tpu.memory_space<vmem>>, vector<8x128xf32>,
    return
  }
  func.func @transform_0(%arg0: i32) -> (i32, i32) {
    %c15_i32 = arith.constant 15 : i32
    %c0_i32 = arith.constant 0 : i32
    return %arg0, %c15_i32 : i32, i32
  }
  func.func @transform_1(%arg0: i32) -> (i32, i32) {
    %c0_i32 = arith.constant 0 : i32
    %c0_i32_0 = arith.constant 0 : i32
    %c0_i32_1 = arith.constant 0 : i32
    return %c0_i32, %c0_i32_0 : i32, i32
  }
  func.func @transform_2(%arg0: i32) -> (i32, i32) {
    %c0_i32 = arith.constant 0 : i32
    %c0_i32_0 = arith.constant 0 : i32
    %c0_i32_1 = arith.constant 0 : i32
    return %c0_i32, %c0_i32_0 : i32, i32
  }
  func.func @transform_3(%arg0: i32) -> (i32, i32) {
    %c0_i32 = arith.constant 0 : i32
    %c0_i32_0 = arith.constant 0 : i32
    %c0_i32_1 = arith.constant 0 : i32
    return %c0_i32, %c0_i32_0 : i32, i32
  }
  func.func @transform_4(%arg0: i32) -> (i32, i32) {
    %c0_i32 = arith.constant 0 : i32
    %c0_i32_0 = arith.constant 0 : i32
    %c0_i32_1 = arith.constant 0 : i32
    return %c0_i32, %c0_i32_0 : i32, i32
  }
  func.func @transform_5(%arg0: i32) -> (i32, i32) {
    %c0_i32 = arith.constant 0 : i32
    %c0_i32_0 = arith.constant 0 : i32
    return %arg0, %c0_i32 : i32, i32
  }
}

</mosaic_0001>

<bundles_post_ra>
// kernel: tpu_custom_call.1
= control target key start
LH: loop header
LB: loop body
LE: loop exit
PB: predicated region body
PF: predicated region fallthrough
CT: control target
= control target key end

     0   :  { %s946_s0 = inlined_call_operand.hbm [shape: f32[8,12288], index: 0, kind: input, shape index: {}]   ;;  %s947_s1 = inlined_call_operand.hbm [shape: bf16[768,128], index: 1, kind: input, shape index: {}]   ;;  %s948_s2 = inlined_call_operand.vmem [shape: f32[1,128], index: 2, kind: input, shape index: {}]   ;;  %s949_s3 = inlined_call_operand.vmem [shape: f32[1,128], index: 3, kind: input, shape index: {}]   ;;  %s950_s4 = inlined_call_operand.<no memory space> [shape: f32[1,1], index: 4, kind: input, shape index: {}]   ;;  %s951_s5 = inlined_call_operand.hbm [shape: f32[8,128], index: 5, kind: output, shape index: {}]  }
   0x1   :  { %v10_v0 = vstv %s950_s4 }
   0x2   :  { %11 = vst [vmem:[#allocation2] sm:$0x1] %v10_v0 }
   0x3   :  { %12 = vsyncpa [#allocation4], 0 }
   0x4   :  { %13 = vsyncpa [#allocation7], 0 }
   0x5   :  { %14 = vsyncpa [#allocation5], 0  ;;  %s20_s22 = scalar_lea.hbm %s946_s0, 11520  ;;  %s868_s23 = smov [#allocation3]  }
   0x6   :  { %s22_s24 = sshll.u32 %s868_s23, 4  ;;  %s869_s25 = smov [#allocation6]   ;;  %s23_s24 = int_to_ptr.vmem [resolvable:$true] %s22_s24 }
   0x7   :  { %s31_s26 = sshll.u32 %s869_s25, 4  ;;  %s817_s29 = scalar_lea.hbm %s946_s0, 12288  ;;  %s32_s26 = int_to_ptr.vmem [resolvable:$true] %s31_s26 }
   0x8   :  { %p794_p0 = scmp.ne.s32.totalorder %s20_s22, %s817_s29  ;;  %p796_p1 = scmp.lt.u32.totalorder %s20_s22, %s946_s0 }
   0x9   :  { %p797_p2 = scmp.lt.u32.totalorder %s817_s29, %s817_s29  ;;  %p799_p4 = scmp.lt.u32.totalorder %s817_s29, %s20_s22 }
   0xb   :  { %p798_p3 = por %p797_p2, %p796_p1 }
   0xd   :  { %p800_p5 = por %p799_p4, %p798_p3 }
   0xf   :  { %p801_p6 = pnand %p800_p5, %p794_p0 }
  0x11   :  { %804 = shalt.err (!%p801_p6)
}
  0x12   :  { %s805_s6 = scalar_lea.vmem %s23_s24, 768  ;;  %p810_p8 = scmp.lt.s32.totalorder %s23_s24, %s23_s24 }
  0x13   :  { %p806_p7 = scmp.ne.s32.totalorder %s23_s24, %s805_s6  ;;  %p811_p9 = scmp.lt.s32.totalorder %s805_s6, %s805_s6 }
  0x15   :  { %p812_p10 = por %p811_p9, %p810_p8 }
  0x17   :  { %p813_p11 = pnand %p812_p10, %p806_p7 }
  0x19   :  { %816 = shalt.err (!%p813_p11)
}
  0x1a   :  { %25 = dma.hbm_to_vmem [thread:$0]  %s20_s22, 768, %s23_s24, [#allocation4]  }
  0x1b   :  { %s818_s9 = scalar_lea.hbm %s947_s1, 6144 }
  0x1c   :  { %p819_p12 = scmp.ne.s32.totalorder %s947_s1, %s818_s9  ;;  %p822_p13 = scmp.lt.u32.totalorder %s818_s9, %s947_s1 }
  0x1e   :  { %p824_p0 = pnand %p822_p13, %p819_p12 }
  0x20   :  { %827 = shalt.err (!%p824_p0)
}
  0x21   :  { %s828_s13 = scalar_lea.vmem %s32_s26, 6144  ;;  %p833_p2 = scmp.lt.s32.totalorder %s32_s26, %s32_s26 }
  0x22   :  { %p829_p1 = scmp.ne.s32.totalorder %s32_s26, %s828_s13  ;;  %p834_p3 = scmp.lt.s32.totalorder %s828_s13, %s828_s13 }
  0x24   :  { %p835_p4 = por %p834_p3, %p833_p2 }
  0x26   :  { %p836_p5 = pnand %p835_p4, %p829_p1 }
  0x28   :  { %839 = shalt.err (!%p836_p5)
}
  0x29   :  { %s870_s14 = smov 64   ;;  %s871_s15 = smov 4  }
  0x2a   :  { %37 = dma.hbm_to_vmem [thread:$0]  %s947_s1, 6144, %s32_s26, [#allocation7], %s870_s14, %s870_s14, %s871_s15  }
  0x2b   :  { %862 = dma.done.wait [#allocation4], 768  }
  0x2c   :  { %863 = vsyncadd [#allocation4], 4294966528 }
  0x2d   :  { %864 = dma.done.wait [#allocation7], 6144  }
  0x2e   :  { %865 = vsyncadd [#allocation7], 4294961152  ;;  %v745_v1 = vld [vmem:[#allocation6 + $0x40] sm:$0xff]   ;;  %v749_v5 = vld [vmem:[#allocation6 + $0x48] sm:$0xff]  }
  0x2f   :  { %v746_v2 = vld [vmem:[#allocation6] sm:$0xff]   ;;  %672 = vmatprep.subr.bf16.mxu0 %v745_v1  ;;  %v750_v6 = vld [vmem:[#allocation6 + $0x8] sm:$0xff]   ;;  %v753_v9 = vld [vmem:[#allocation6 + $0x50] sm:$0xff]  }
  0x30   :  { %v747_v3 = vld [vmem:[#allocation6 + $0xc0] sm:$0xff]   ;;  %673 = vmatpush3.bf16.msra.mxu0 %v746_v2  ;;  %v751_v7 = vld [vmem:[#allocation6 + $0xc8] sm:$0xff]   ;;  %v754_v10 = vld [vmem:[#allocation6 + $0x10] sm:$0xff]  }
  0x31   :  { %v748_v4 = vld [vmem:[#allocation6 + $0x80] sm:$0xff]   ;;  %694 = vmatprep.subr.bf16.mxu1 %v747_v3  ;;  %674 = vmatprep.subr.bf16.mxu0 %v749_v5  ;;  %v752_v8 = vld [vmem:[#allocation6 + $0x88] sm:$0xff]   ;;  %v755_v11 = vld [vmem:[#allocation6 + $0xd0] sm:$0xff]  }
  0x32   :  { %695 = vmatpush3.bf16.msra.mxu1 %v748_v4  ;;  %v756_v12 = vld [vmem:[#allocation6 + $0x90] sm:$0xff]   ;;  %v757_v13 = vld [vmem:[#allocation6 + $0x58] sm:$0xff]   ;;  %v761_v17 = vld [vmem:[#allocation6 + $0x60] sm:$0xff]  }
  0x33   :  { %696 = vmatprep.subr.bf16.mxu1 %v751_v7  ;;  %v758_v14 = vld [vmem:[#allocation6 + $0x18] sm:$0xff]   ;;  %v762_v18 = vld [vmem:[#allocation6 + $0x20] sm:$0xff]   ;;  %v765_v21 = vld [vmem:[#allocation6 + $0x68] sm:$0xff]  }
  0x34   :  { %675 = vmatpush3.bf16.msra.mxu0 %v750_v6  ;;  %v759_v15 = vld [vmem:[#allocation6 + $0xd8] sm:$0xff]   ;;  %v763_v19 = vld [vmem:[#allocation6 + $0xe0] sm:$0xff]   ;;  %v766_v22 = vld [vmem:[#allocation6 + $0x28] sm:$0xff]  }
  0x35   :  { %676 = vmatprep.subr.bf16.mxu0 %v753_v9  ;;  %v760_v16 = vld [vmem:[#allocation6 + $0x98] sm:$0xff]   ;;  %v764_v20 = vld [vmem:[#allocation6 + $0xa0] sm:$0xff]   ;;  %v767_v23 = vld [vmem:[#allocation6 + $0xe8] sm:$0xff]  }
  0x36   :  { %697 = vmatpush3.bf16.msra.mxu1 %v752_v8  ;;  %v768_v24 = vld [vmem:[#allocation6 + $0xa8] sm:$0xff]   ;;  %v769_v25 = vld [vmem:[#allocation6 + $0x70] sm:$0xff]   ;;  %v773_v29 = vld [vmem:[#allocation6 + $0x78] sm:$0xff]  }
  0x37   :  { %698 = vmatprep.subr.bf16.mxu1 %v755_v11  ;;  %v770_v26 = vld [vmem:[#allocation6 + $0x30] sm:$0xff]   ;;  %v774_v30 = vld [vmem:[#allocation6 + $0x38] sm:$0xff]   ;;  %v777_v37 = vld [vmem:[#allocation6 + $0x140] sm:$0xff]  }
  0x38   :  { %677 = vmatpush3.bf16.msra.mxu0 %v754_v10  ;;  %v771_v27 = vld [vmem:[#allocation6 + $0xf0] sm:$0xff]   ;;  %v775_v31 = vld [vmem:[#allocation6 + $0xf8] sm:$0xff]   ;;  %v54_v38 = vld [vmem:[#allocation3 + $0x18] sm:$0xff] }
  0x39   :  { %678 = vmatprep.subr.bf16.mxu0 %v757_v13  ;;  %v772_v28 = vld [vmem:[#allocation6 + $0xb0] sm:$0xff]   ;;  %v52_v32 = vld [vmem:[#allocation3 + $0x8] sm:$0xff]  ;;  %v60_v39 = vpack.c.bf16 %v54_v38, %v54_v38  ;;  %v778_v40 = vld [vmem:[#allocation6 + $0x100] sm:$0xff]  }
  0x3a   :  { %699 = vmatpush3.bf16.msra.mxu1 %v756_v12  ;;  %v58_v33 = vpack.c.bf16 %v52_v32, %v52_v32  ;;  %v776_v34 = vld [vmem:[#allocation6 + $0xb8] sm:$0xff]   ;;  %v51_v35 = vld [vmem:[#allocation3] sm:$0xff]  ;;  %v53_v41 = vld [vmem:[#allocation3 + $0x10] sm:$0xff] }
  0x3b   :  { %700 = vmatprep.subr.bf16.mxu1 %v759_v15  ;;  %v57_v36 = vpack.c.bf16 %v51_v35, %v51_v35  ;;  %526 = vmatprep.mubr.bf16.mxu1 %v60_v39  ;;  %v59_v42 = vpack.c.bf16 %v53_v41, %v53_v41  ;;  %v779_v43 = vld [vmem:[#allocation6 + $0x148] sm:$0xff]   ;;  %v781_v45 = vld [vmem:[#allocation6 + $0x150] sm:$0xff]   ;;  %v783_v47 = vld [vmem:[#allocation6 + $0x158] sm:$0xff]  }
  0x3c   :  { %679 = vmatpush3.bf16.msra.mxu0 %v758_v14  ;;  %486 = vmatprep.mubr.bf16.mxu0 %v58_v33  ;;  %v780_v44 = vld [vmem:[#allocation6 + $0x108] sm:$0xff]   ;;  %v782_v46 = vld [vmem:[#allocation6 + $0x110] sm:$0xff]   ;;  %v784_v48 = vld [vmem:[#allocation6 + $0x118] sm:$0xff]  }
  0x3d   :  { %680 = vmatprep.subr.bf16.mxu0 %v761_v17  ;;  %v785_v49 = vld [vmem:[#allocation6 + $0x160] sm:$0xff]   ;;  %v787_v51 = vld [vmem:[#allocation6 + $0x168] sm:$0xff]   ;;  %v56_v52 = vld [vmem:[#allocation3 + $0x28] sm:$0xff] }
  0x3e   :  { %701 = vmatpush3.bf16.msra.mxu1 %v760_v16  ;;  %v786_v50 = vld [vmem:[#allocation6 + $0x120] sm:$0xff]   ;;  %v62_v53 = vpack.c.bf16 %v56_v52, %v56_v52  ;;  %v788_v54 = vld [vmem:[#allocation6 + $0x128] sm:$0xff]   ;;  %v789_v55 = vld [vmem:[#allocation6 + $0x170] sm:$0xff]  }
  0x3f   :  { %702 = vmatprep.subr.bf16.mxu1 %v763_v19  ;;  %v790_v56 = vld [vmem:[#allocation6 + $0x130] sm:$0xff]   ;;  %v791_v57 = vld [vmem:[#allocation6 + $0x178] sm:$0xff]   ;;  %v621_v62 = vld [vmem:[%s948_s2] ss:$0 sm:$0xff]  ;;  %v872_v19 = vmov 0   ;;  %s873_s2 = smov [#allocation8]  }
  0x40   :  { %681 = vmatpush3.bf16.msra.mxu0 %v762_v18  ;;  %v792_v58 = vld [vmem:[#allocation6 + $0x138] sm:$0xff]   ;;  %v55_v59 = vld [vmem:[#allocation3 + $0x20] sm:$0xff]  ;;  %v670_v16 = vld [vmem:[%s949_s3] ss:$0 sm:$0xff]  ;;  %744 = vset.pattern.permute.xlu0 %v872_v19  ;;  %s611_s21 = sshll.u32 %s873_s2, 4  ;;  %s612_s21 = int_to_ptr.vmem [resolvable:$true] %s611_s21 }
  0x41   :  { %682 = vmatprep.subr.bf16.mxu0 %v765_v21  ;;  %v61_v60 = vpack.c.bf16 %v55_v59, %v55_v59  ;;  %s840_s3 = scalar_lea.vmem %s612_s21, 128  ;;  %p845_p7 = scmp.lt.s32.totalorder %s612_s21, %s612_s21 }
  0x42   :  { %703 = vmatpush3.bf16.msra.mxu1 %v764_v20  ;;  %v671_v20 = vld [vmem:[#allocation2] ss:$0 sm:$0xff]  ;;  %p841_p6 = scmp.ne.s32.totalorder %s612_s21, %s840_s3  ;;  %p846_p8 = scmp.lt.s32.totalorder %s840_s3, %s840_s3 }
  0x43   :  { %704 = vmatprep.subr.bf16.mxu1 %v767_v23  ;;  %v593_v23 = vlaneseq }
  0x44   :  { %683 = vmatpush3.bf16.msra.mxu0 %v766_v22  ;;  %p847_p9 = por %p846_p8, %p845_p7 }
  0x45   :  { %684 = vmatprep.subr.bf16.mxu0 %v769_v25 }
  0x46   :  { %705 = vmatpush3.bf16.msra.mxu1 %v768_v24  ;;  %v594_v24 = vand.u32 127, %v593_v23  ;;  %p848_p10 = pnand %p847_p9, %p841_p6 }
  0x47   :  { %706 = vmatprep.subr.bf16.mxu1 %v771_v27 }
  0x48   :  { %685 = vmatpush3.bf16.msra.mxu0 %v770_v26  ;;  %vm595_vm0 = vcmp.lt.s32.totalorder %v594_v24, 16  ;;  %vm597_vm1 = vcmp.eq.s32.totalorder %v594_v24, 16 }
  0x49   :  { %686 = vmatprep.subr.bf16.mxu0 %v773_v29 }
  0x4a   :  { %707 = vmatpush3.bf16.msra.mxu1 %v772_v28 }
  0x4b   :  { %708 = vmatprep.subr.bf16.mxu1 %v775_v31 }
  0x4c   :  { %687 = vmatpush3.bf16.msra.mxu0 %v774_v30 }
  0x4d   :  { %716 = vmatprep.subr.bf16.mxu0 %v777_v37 }
  0x4e   :  { %709 = vmatpush3.bf16.msra.mxu1 %v776_v34 }
  0x4f   :  { %487 = vmatmul.mubr.bf16.vlgmr.msra.gmra.mrb[0].mxu0 %v57_v36 }
  0x50   :  { %717 = vmatpush3.bf16.msra.mxu0 %v778_v40  ;;  %566 = vmatprep.mubr.bf16.mxu0 %v62_v53 }
  0x51   :  { %527 = vmatmul.mubr.bf16.vlgmr.msra.gmra.mrb[0].mxu1 %v59_v42  ;;  %718 = vmatprep.subr.bf16.mxu0 %v779_v43 }
  0x54   :  { %719 = vmatpush3.bf16.msra.mxu0 %v780_v44 }
  0x55   :  { %720 = vmatprep.subr.bf16.mxu0 %v781_v45 }
  0x58   :  { %721 = vmatpush3.bf16.msra.mxu0 %v782_v46 }
  0x59   :  { %722 = vmatprep.subr.bf16.mxu0 %v783_v47 }
  0x5c   :  { %723 = vmatpush3.bf16.msra.mxu0 %v784_v48 }
  0x5d   :  { %724 = vmatprep.subr.bf16.mxu0 %v785_v49 }
  0x60   :  { %725 = vmatpush3.bf16.msra.mxu0 %v786_v50 }
  0x61   :  { %726 = vmatprep.subr.bf16.mxu0 %v787_v51 }
  0x64   :  { %727 = vmatpush3.bf16.msra.mxu0 %v788_v54 }
  0x65   :  { %728 = vmatprep.subr.bf16.mxu0 %v789_v55 }
  0x68   :  { %729 = vmatpush3.bf16.msra.mxu0 %v790_v56 }
  0x69   :  { %730 = vmatprep.subr.bf16.mxu0 %v791_v57 }
  0x6c   :  { %731 = vmatpush3.bf16.msra.mxu0 %v792_v58 }
  0x6f   :  { %567 = vmatmul.mubr.bf16.vlgmr.msra.gmra.mrb[4].mxu0 %v61_v60 }
 0x122   :  { %v688_v61 = vpop.f32.mrb[0].mxu0 }
 0x123   :  { %v689_v63 = vpop.f32.mrb[1].mxu0 }
 0x124   :  { %v690_v0 = vadd.f32 %v689_v63, %v688_v61  ;;  %v691_v1 = vpop.f32.mrb[2].mxu0  ;;  %v710_v2 = vpop.f32.mrb[0].mxu1 }
 0x125   :  { %v692_v3 = vpop.f32.mrb[3].mxu0  ;;  %v711_v5 = vpop.f32.mrb[1].mxu1 }
 0x126   :  { %v489_v4 = vadd.f32 %v690_v0, %v621_v62  ;;  %v712_v6 = vadd.f32 %v711_v5, %v710_v2  ;;  %v713_v7 = vpop.f32.mrb[2].mxu1 }
 0x127   :  { %v714_v8 = vpop.f32.mrb[3].mxu1 }
 0x128   :  { %v529_v9 = vadd.f32 %v712_v6, %v489_v4 }
 0x142   :  { %v732_v10 = vpop.f32.mrb[4].mxu0 }
 0x143   :  { %v733_v11 = vpop.f32.mrb[5].mxu0 }
 0x144   :  { %v734_v12 = vadd.f32 %v733_v11, %v732_v10  ;;  %v735_v13 = vpop.f32.mrb[6].mxu0 }
 0x145   :  { %v736_v14 = vpop.f32.mrb[7].mxu0 }
 0x146   :  { %v569_v15 = vadd.f32 %v734_v12, %v529_v9 }
 0x148   :  { %v574_v17 = vmax.f32 %v569_v15, 0.0  ;;  %v596_v25 = vsel %vm595_vm0, %v569_v15, 0.0 }
 0x14a   :  { %v582_v18 = vmul.f32 %v670_v16, %v574_v17 }
 0x14c   :  { %583 = vadd.xlane.f32.xlu0 %v582_v18 }
 0x1d9   :  { %v584_v21 = vpop.xlane.xlu0 %583 }
 0x1da   :  { %v592_v22 = vadd.f32 %v671_v20, %v584_v21 }
 0x1dc   :  { %600 = vperm.xlu0 %744, %v592_v22  }
 0x25b   :  { %v601_v26 = vpop.permute.xlu0 %600 }
 0x25c   :  { %v603_v27 = vsel %vm597_vm1, %v601_v26, %v596_v25 }
 0x25d   :  { %604 = vst [vmem:[#allocation8] sm:$0xff] %v603_v27 }
 0x25e   :  { %851 = shalt.err (!%p848_p10)
}
 0x25f   :  { %s852_s24 = scalar_lea.hbm %s951_s5, 128 }
 0x260   :  { %p853_p11 = scmp.ne.s32.totalorder %s951_s5, %s852_s24  ;;  %p856_p12 = scmp.lt.u32.totalorder %s852_s24, %s951_s5 }
 0x262   :  { %p858_p13 = pnand %p856_p12, %p853_p11 }
 0x264   :  { %861 = shalt.err (!%p858_p13)
}
 0x265   :  { %614 = dma.vmem_to_hbm [thread:$0]  %s612_s21, 128, %s951_s5, [#allocation5]  }
 0x266   :  { %866 = dma.done.wait [#allocation5], 128  }
 0x267   :  { %867 = vsyncadd [#allocation5], 4294967168 }
 0x268   :  { %618 = vsyncpa [#allocation4], 1 }
 0x269   :  { %619 = vsyncpa [#allocation7], 1 }
 0x26a   :  { %620 = vsyncpa [#allocation5], 1 }

</bundles_post_ra>
